<compile_context>
chip_gen: v7x
topology: tpu7x:2x2x1
jax: 0.10.0
libtpu: 0.0.40
codegen_flags: <defaults>
</compile_context>

<pallas_src>
import functools

import jax
import jax.numpy as jnp
from jax.experimental import pallas as pl
from jax.experimental.pallas import tpu as pltpu


# ----------------------------------------------------------------------------
# Kernel: fused SimAM over a (tile_rows, H*W) slab (each row = one plane).
# ----------------------------------------------------------------------------
def _simam_kernel(x_ref, o_ref, *, inv_hw, inv_n, e_lambda):
    x = x_ref[...].astype(jnp.float32)                    # (tile_rows, H*W)

    # Single-pass statistics: both reductions read x directly.
    sum_x = jnp.sum(x, axis=1, keepdims=True)
    sum_x2 = jnp.sum(x * x, axis=1, keepdims=True)
    mu = sum_x * inv_hw
    s = jnp.maximum(sum_x2 - sum_x * mu, 0.0)             # sum((x - mu)^2) >= 0

    # Per-row exact reciprocal of the denominator; per-element work is then a
    # single multiply.  (approx=True would be cheaper still but its ~1e-3
    # relative error is outside this test's tolerance.)
    inv_denom = pl.reciprocal(4.0 * (s * inv_n + e_lambda))

    d = x - mu
    y = d * d * inv_denom + 0.5
    o_ref[...] = (x * jax.nn.sigmoid(y)).astype(o_ref.dtype)


# ----------------------------------------------------------------------------
# Tiling helpers (generation aware, cdiv grid — no divisor requirement).
# ----------------------------------------------------------------------------
def _align_down(v, m):
    return (v // m) * m


def _align_up(v, m):
    return ((v + m - 1) // m) * m


def _vmem_capacity_bytes():
    try:
        info = pltpu.get_tpu_info()
        cap = getattr(info, "vmem_capacity_bytes", None)
        if cap:
            return int(cap)
    except Exception:
        pass
    return 64 << 20  # conservative fallback (v7x per-TensorCore VMEM)


def _choose_tile_rows(rows, hw, budget_bytes, min_steps=4):
    """Largest 8-aligned row tile whose nominal f32 block fits `budget_bytes`,
    capped so the grid has >= `min_steps` blocks when the row count allows
    (megacore sharding on v7x + keeps double-buffering active)."""
    row_bytes = hw * 4                      # f32 intermediates dominate
    fit = max(1, budget_bytes // row_bytes)
    if fit >= rows:
        tile = rows                         # full extent is always legal
    else:
        tile = max(8, _align_down(fit, 8))
    if rows >= min_steps * 8:
        tile = min(tile, max(8, _align_up(pl.cdiv(rows, min_steps), 8)))
    return min(tile, rows)


# ----------------------------------------------------------------------------
# Wrapper: NCHW in, NCHW out (PyTorch convention).
# ----------------------------------------------------------------------------
def simam(x_nchw, e_lambda=1e-4):
    N, C, H, W = x_nchw.shape
    rows, hw = N * C, H * W
    x2 = x_nchw.reshape(rows, hw)           # contiguous -> free reshape
    # TODO(synk): for H*W < 128 the lane axis is underfilled; packing several
    # planes per vreg row (or putting N*C on lanes) would be denser.
    # TODO(synk): planes with H*W of several MiB per row would need a second
    # 'arbitrary' grid axis over H*W with scratch accumulators.

    vmem_cap = _vmem_capacity_bytes()
    # Real live footprint per grid step is ~5-6x the nominal block (double-
    # buffered in/out + f32 intermediates): keep the nominal block small
    # relative to this chip's VMEM (2 MiB on 64 MiB parts, 8 MiB on 128 MiB).
    budget = (2 << 20) if vmem_cap <= (64 << 20) else (8 << 20)
    tile_rows = _choose_tile_rows(rows, hw, budget)
    grid = (pl.cdiv(rows, tile_rows),)      # ragged last block is clipped

    kernel = functools.partial(
        _simam_kernel,
        inv_hw=1.0 / float(hw),
        inv_n=1.0 / float(max(hw - 1, 1)),  # n = H*W - 1
        e_lambda=float(e_lambda),
    )

    out = pl.pallas_call(
        kernel,
        out_shape=jax.ShapeDtypeStruct((rows, hw), x_nchw.dtype),
        grid_spec=pltpu.PrefetchScalarGridSpec(
            num_scalar_prefetch=0,
            grid=grid,
            in_specs=[pl.BlockSpec((tile_rows, hw), lambda i: (i, 0))],
            out_specs=pl.BlockSpec((tile_rows, hw), lambda i: (i, 0)),
        ),
        compiler_params=pltpu.CompilerParams(
            dimension_semantics=("parallel",),
            # ~75% of physical VMEM: 48 MiB on v7x, 96 MiB on v5e/v6e.
            vmem_limit_bytes=min(int(vmem_cap * 3 // 4), 96 << 20),
        ),
    )(x2)

    return out.reshape(N, C, H, W)


# ----------------------------------------------------------------------------
# Pure-JAX reference (mirrors the PyTorch forward exactly)
# ----------------------------------------------------------------------------
def _simam_ref(x, e_lambda=1e-4):
    n = x.shape[2] * x.shape[3] - 1
    mu = jnp.mean(x, axis=(2, 3), keepdims=True)
    d2 = (x - mu) ** 2
    y = d2 / (4.0 * (jnp.sum(d2, axis=(2, 3), keepdims=True) / n + e_lambda)) + 0.5
    return x * jax.nn.sigmoid(y)


if __name__ == "__main__":
    N, C, H, W = 2, 4, 16, 16
    key = jax.random.PRNGKey(0)
    x = jax.random.normal(key, (N, C, H, W), jnp.float32)   # NCHW, like PyTorch

    out = jax.block_until_ready(simam(x))
    ref = jax.block_until_ready(_simam_ref(x))

    assert out.shape == (N, C, H, W), out.shape
    max_err = float(jnp.max(jnp.abs(out - ref)))
    assert jnp.allclose(out, ref, atol=2e-5, rtol=2e-5), max_err
    print("KERNEL_OK")
</pallas_src>

<mosaic_0001>
module attributes {stable_mosaic.version = 11 : i64} {
  func.func @_simam_kernel(%arg0: i32, %arg1: memref<8x256xf32, #tpu.memory_space<vmem>>, %arg2: memref<8x256xf32, #tpu.memory_space<vmem>>) attributes {dimension_semantics = [#tpu.dimension_semantics<parallel>], iteration_bounds = array<i64: 1>, scalar_prefetch = 0 : i64, scratch_operands = 0 : i64, tpu.core_type = #tpu.core_type<tc>, window_params = [{transform_indices = @transform_0, window_bounds = array<i64: 8, 256>}, {transform_indices = @transform_1, window_bounds = array<i64: 8, 256>}]} {
    %c0 = arith.constant 0 : index
    %c0_0 = arith.constant 0 : index
    %0 = vector.load %arg1[%c0, %c0_0] : memref<8x256xf32, #tpu.memory_space<vmem>>, vector<8x256xf32>
    %cst = arith.constant dense<0.000000e+00> : vector<8xf32>
    %1 = vector.multi_reduction <add>, %0, %cst [1] : vector<8x256xf32> to vector<8xf32>
    %2 = vector.shape_cast %1 : vector<8xf32> to vector<8x1xf32>
    %3 = arith.mulf %0, %0 : vector<8x256xf32>
    %cst_1 = arith.constant dense<0.000000e+00> : vector<8xf32>
    %4 = vector.multi_reduction <add>, %3, %cst_1 [1] : vector<8x256xf32> to vector<8xf32>
    %5 = vector.shape_cast %4 : vector<8xf32> to vector<8x1xf32>
    %cst_2 = arith.constant 3.906250e-03 : f32
    %6 = vector.broadcast %cst_2 : f32 to vector<8x1xf32>
    %7 = arith.mulf %2, %6 : vector<8x1xf32>
    %8 = arith.mulf %2, %7 : vector<8x1xf32>
    %9 = arith.subf %5, %8 : vector<8x1xf32>
    %cst_3 = arith.constant 0.000000e+00 : f32
    %10 = vector.broadcast %cst_3 : f32 to vector<8x1xf32>
    %11 = arith.maximumf %9, %10 : vector<8x1xf32>
    %cst_4 = arith.constant 0.00392156886 : f32
    %12 = vector.broadcast %cst_4 : f32 to vector<8x1xf32>
    %13 = arith.mulf %11, %12 : vector<8x1xf32>
    %cst_5 = arith.constant 9.99999974E-5 : f32
    %14 = vector.broadcast %cst_5 : f32 to vector<8x1xf32>
    %15 = arith.addf %13, %14 : vector<8x1xf32>
    %cst_6 = arith.constant 4.000000e+00 : f32
    %16 = vector.broadcast %cst_6 : f32 to vector<8x1xf32>
    %17 = arith.mulf %16, %15 : vector<8x1xf32>
    %18 = tpu.reciprocal %17 : vector<8x1xf32> -> vector<8x1xf32>
    %19 = vector.broadcast %7 : vector<8x1xf32> to vector<8x256xf32>
    %20 = arith.subf %0, %19 : vector<8x256xf32>
    %21 = arith.mulf %20, %20 : vector<8x256xf32>
    %22 = vector.broadcast %18 : vector<8x1xf32> to vector<8x256xf32>
    %23 = arith.mulf %21, %22 : vector<8x256xf32>
    %cst_7 = arith.constant 5.000000e-01 : f32
    %24 = vector.broadcast %cst_7 : f32 to vector<8x256xf32>
    %25 = arith.addf %23, %24 : vector<8x256xf32>
    %26 = arith.negf %25 : vector<8x256xf32>
    %27 = math.exp %26 : vector<8x256xf32>
    %cst_8 = arith.constant 1.000000e+00 : f32
    %28 = vector.broadcast %cst_8 : f32 to vector<8x256xf32>
    %29 = arith.addf %28, %27 : vector<8x256xf32>
    %30 = arith.divf %28, %29 : vector<8x256xf32>
    %31 = arith.mulf %0, %30 : vector<8x256xf32>
    %c0_9 = arith.constant 0 : index
    %c0_10 = arith.constant 0 : index
    %32 = vector.load %arg2[%c0_9, %c0_10] : memref<8x256xf32, #tpu.memory_space<vmem>>, vector<8x256xf32>
    tpu.vector_store %arg2[%c0_9, %c0_10], %31 {strides = array<i32>} : memref<8x256xf32, #tpu.memory_space<vmem>>, vector<8x256xf32>,
    return
  }
  func.func @transform_0(%arg0: i32) -> (i32, i32) {
    %c0_i32 = arith.constant 0 : i32
    %c0_i32_0 = arith.constant 0 : i32
    return %arg0, %c0_i32 : i32, i32
  }
  func.func @transform_1(%arg0: i32) -> (i32, i32) {
    %c0_i32 = arith.constant 0 : i32
    %c0_i32_0 = arith.constant 0 : i32
    return %arg0, %c0_i32 : i32, i32
  }
}

</mosaic_0001>

<bundles_post_ra>
// kernel: tpu_custom_call.1
= control target key start
LH: loop header
LB: loop body
LE: loop exit
PB: predicated region body
PF: predicated region fallthrough
CT: control target
= control target key end

     0   :  { %6 = vsyncpa [#allocation3], 0  ;;  %s176_s0 = inlined_call_operand.hbm [shape: f32[8,256], index: 0, kind: input, shape index: {}]   ;;  %s177_s1 = inlined_call_operand.hbm [shape: f32[8,256], index: 1, kind: output, shape index: {}]  }
   0x1   :  { %7 = vsyncpa [#allocation4], 0  ;;  %s140_s6 = smov [#allocation2]   ;;  %s92_s10 = scalar_lea.hbm %s176_s0, 256 }
   0x2   :  { %s14_s7 = sshll.u32 %s140_s6, 4  ;;  %p93_p0 = scmp.ne.s32.totalorder %s176_s0, %s92_s10  ;;  %s15_s7 = int_to_ptr.vmem [resolvable:$true] %s14_s7 }
   0x3   :  { %p96_p1 = scmp.lt.u32.totalorder %s92_s10, %s176_s0 }
   0x5   :  { %p98_p2 = pnand %p96_p1, %p93_p0 }
   0x7   :  { %101 = shalt.err (!%p98_p2)
}
   0x8   :  { %s102_s15 = scalar_lea.vmem %s15_s7, 256  ;;  %p107_p4 = scmp.lt.s32.totalorder %s15_s7, %s15_s7 }
   0x9   :  { %p103_p3 = scmp.ne.s32.totalorder %s15_s7, %s102_s15  ;;  %p108_p5 = scmp.lt.s32.totalorder %s102_s15, %s102_s15 }
   0xb   :  { %p109_p6 = por %p108_p5, %p107_p4 }
   0xd   :  { %p110_p7 = pnand %p109_p6, %p103_p3 }
   0xf   :  { %113 = shalt.err (!%p110_p7)
}
  0x10   :  { %17 = dma.hbm_to_vmem [thread:$0]  %s176_s0, 256, %s15_s7, [#allocation3]  }
  0x11   :  { %136 = dma.done.wait [#allocation3], 256  }
  0x12   :  { %137 = vsyncadd [#allocation3], 4294967040  ;;  %v21_v0 = vld [vmem:[#allocation2] sm:$0xff]  ;;  %v22_v1 = vld [vmem:[#allocation2 + $0x8] sm:$0xff]  ;;  %s141_s0 = smov [#allocation5]  }
  0x13   :  { %v23_v2 = vadd.f32 %v22_v1, %v21_v0  ;;  %v26_v3 = vmul.f32 %v21_v0, %v21_v0  ;;  %v27_v4 = vmul.f32 %v22_v1, %v22_v1  ;;  %s69_s18 = sshll.u32 %s141_s0, 4  ;;  %s70_s18 = int_to_ptr.vmem [resolvable:$true] %s69_s18 }
  0x14   :  { %s114_s19 = scalar_lea.vmem %s70_s18, 256  ;;  %p119_p9 = scmp.lt.s32.totalorder %s70_s18, %s70_s18 }
  0x15   :  { %24 = vadd.xlane.f32.xlu0 %v23_v2  ;;  %v28_v5 = vadd.f32 %v27_v4, %v26_v3  ;;  %p115_p8 = scmp.ne.s32.totalorder %s70_s18, %s114_s19  ;;  %p120_p10 = scmp.lt.s32.totalorder %s114_s19, %s114_s19 }
  0x17   :  { %p121_p11 = por %p120_p10, %p119_p9 }
  0x19   :  { %29 = vadd.xlane.f32.xlu0 %v28_v5  ;;  %p122_p12 = pnand %p121_p11, %p115_p8 }
  0xa2   :  { %v25_v6 = vpop.xlane.xlu0 %24 }
  0xa3   :  { %v31_v7 = vmul.f32 0.00390625, %v25_v6 }
  0xa5   :  { %v32_v8 = vmul.f32 %v31_v7, %v25_v6  ;;  %v39_v15 = vsub.f32 %v21_v0, %v31_v7  ;;  %v40_v16 = vsub.f32 %v22_v1, %v31_v7 }
  0xa6   :  { %v30_v9 = vpop.xlane.xlu0 %29 }
  0xa7   :  { %v33_v10 = vsub.f32 %v30_v9, %v32_v8  ;;  %v41_v17 = vmul.f32 %v39_v15, %v39_v15  ;;  %v42_v18 = vmul.f32 %v40_v16, %v40_v16 }
  0xa9   :  { %v34_v11 = vmax.f32 %v33_v10, 0.0 }
  0xab   :  { %v35_v12 = vmul.f32 0.003921569, %v34_v11 }
  0xad   :  { %v36_v13 = vadd.f32 0.0001, %v35_v12 }
  0xaf   :  { %v37_v14 = vmul.f32 4.0, %v36_v13 }
  0xb1   :  { %82 = vrcp.f32 %v37_v14 }
  0xbb   :  { %v83_v19 = vpop.eup %82 }
  0xbc   :  { %v43_v20 = vmul.f32 %v83_v19, %v41_v17  ;;  %v44_v21 = vmul.f32 %v83_v19, %v42_v18 }
  0xbe   :  { %v45_v22 = vadd.f32 0.5, %v43_v20  ;;  %v46_v23 = vadd.f32 0.5, %v44_v21 }
  0xc0   :  { %v78_v24 = vmul.f32 -1.442695, %v45_v22  ;;  %v79_v25 = vmul.f32 -1.442695, %v46_v23 }
  0xc2   :  { %84 = vpow2.f32 %v78_v24 }
  0xc3   :  { %86 = vpow2.f32 %v79_v25 }
  0xcc   :  { %v85_v26 = vpop.eup %84 }
  0xcd   :  { %v87_v27 = vpop.eup %86  ;;  %v53_v28 = vadd.f32 1.0, %v85_v26 }
  0xce   :  { %v54_v29 = vadd.f32 1.0, %v87_v27 }
  0xcf   :  { %88 = vrcp.f32 %v53_v28 }
  0xd0   :  { %90 = vrcp.f32 %v54_v29 }
  0xd9   :  { %v89_v30 = vpop.eup %88 }
  0xda   :  { %v91_v31 = vpop.eup %90  ;;  %v59_v32 = vmul.f32 %v89_v30, %v21_v0 }
  0xdb   :  { %v60_v33 = vmul.f32 %v91_v31, %v22_v1 }
  0xdc   :  { %61 = vst [vmem:[#allocation5] sm:$0xff] %v59_v32 }
  0xdd   :  { %62 = vst [vmem:[#allocation5 + $0x8] sm:$0xff] %v60_v33 }
  0xde   :  { %125 = shalt.err (!%p122_p12)
}
  0xdf   :  { %s126_s22 = scalar_lea.hbm %s177_s1, 256 }
  0xe0   :  { %p127_p13 = scmp.ne.s32.totalorder %s177_s1, %s126_s22  ;;  %p130_p0 = scmp.lt.u32.totalorder %s126_s22, %s177_s1 }
  0xe2   :  { %p132_p1 = pnand %p130_p0, %p127_p13 }
  0xe4   :  { %135 = shalt.err (!%p132_p1)
}
  0xe5   :  { %72 = dma.vmem_to_hbm [thread:$0]  %s70_s18, 256, %s177_s1, [#allocation4]  }
  0xe6   :  { %138 = dma.done.wait [#allocation4], 256  }
  0xe7   :  { %139 = vsyncadd [#allocation4], 4294967040 }
  0xe8   :  { %76 = vsyncpa [#allocation3], 1 }
  0xe9   :  { %77 = vsyncpa [#allocation4], 1 }

</bundles_post_ra>
